<compile_context>
chip_gen: v6e
topology: v6e:2x2x1
jax: 0.10.0
libtpu: 0.0.40
codegen_flags: <defaults>
</compile_context>

<pallas_src>
import jax
import jax.numpy as jnp
from jax.experimental import pallas as pl
from jax.experimental.pallas import tpu as pltpu


_TARGET_TILE_BYTES = 2 * 1024 * 1024   # ~2 MiB per buffer
_MAX_TN = 16384                        # lane-tile cap (multiple of 128)
_SMALL_INPUT_BYTES = 256 * 1024        # below this, plain XLA is strictly faster


def scalar_weight_kernel(x_ref, w_ref, o_ref):
    # x_ref: (TM, TN) tile of the flattened input (native dtype)
    # w_ref: (1,  TN) pre-expanded weight row (output dtype)
    # o_ref: (TM, TN) output tile (promoted dtype)
    o_ref[...] = x_ref[...].astype(o_ref.dtype) * w_ref[...]


def scalar_weight(x: jax.Array, weight: jax.Array, *,
                  force_pallas: bool = False,
                  tm: int | None = None,
                  tn: int | None = None) -> jax.Array:
    """x: (..., H, W); weight: (L,) with L == H or L == 1 (PyTorch broadcast rule)."""
    assert x.ndim >= 2, "ScalarWeight kernel expects x with at least 2 dims (..., H, W)"
    H, W = x.shape[-2], x.shape[-1]
    L = weight.shape[0]
    assert L == H or L == 1, f"weight len {L} must broadcast against H={H}"

    # PyTorch-style type promotion (e.g. bf16 x * f32 weight -> f32 out).
    out_dtype = jnp.result_type(x.dtype, weight.dtype)

    # Small-input fast path: let XLA fuse the multiply; pipeline/launch overhead
    # would dominate a Pallas call at these sizes.
    total_bytes = x.size * jnp.dtype(out_dtype).itemsize
    if not force_pallas and total_bytes < _SMALL_INPUT_BYTES:
        return x.astype(out_dtype) * weight.astype(out_dtype)[:, None]

    Lw = H * W
    R = x.size // Lw

    # Free reshape: collapse leading dims into rows, last two dims into lanes.
    x_flat = x.reshape(R, Lw)
    # Pre-expanded, lane-dense weight row (tiny; DMA'd as a (1, TN) block).
    w_row = jnp.broadcast_to(weight.astype(out_dtype).reshape(L, 1), (H, W)).reshape(1, Lw)

    x_item = jnp.dtype(x.dtype).itemsize
    o_item = jnp.dtype(out_dtype).itemsize
    # Sublane packing: 8 rows for 32-bit, 16 for 16-bit, 32 for 8-bit.
    sub = {1: 32, 2: 16, 4: 8}.get(min(x_item, o_item), 8)

    if tn is None:
        # Lane tile: multiple of 128 when possible; otherwise full extent
        # (allowed because it equals the array dim, at the cost of masked stores).
        tn = min(Lw, _MAX_TN) if Lw % 128 == 0 else Lw
    if tm is None:
        budget_rows = max(1, _TARGET_TILE_BYTES // (tn * max(x_item, o_item)))
        if budget_rows >= R:
            tm = R                                   # whole row extent (full dim allowed)
        else:
            tm = max(sub, (budget_rows // sub) * sub)  # packed-sublane multiple

    grid = (pl.cdiv(R, tm), pl.cdiv(Lw, tn))

    out_flat = pl.pallas_call(
        scalar_weight_kernel,
        out_shape=jax.ShapeDtypeStruct((R, Lw), out_dtype),
        grid=grid,
        in_specs=[
            pl.BlockSpec((tm, tn), lambda i, j: (i, j)),
            pl.BlockSpec((1, tn), lambda i, j: (0, j)),
        ],
        out_specs=pl.BlockSpec((tm, tn), lambda i, j: (i, j)),
        compiler_params=pltpu.CompilerParams(
            dimension_semantics=("parallel", "parallel"),
        ),
    )(x_flat, w_row)

    return out_flat.reshape(x.shape)


if __name__ == "__main__":
    key = jax.random.PRNGKey(0)
    k1, k2 = jax.random.split(key)

    # Case 1: canonical small shape (B, C, H, W) with len == H; force the Pallas path.
    B, C, H, W = 2, 4, 16, 16
    init_val = 0.5
    x = jax.random.normal(k1, (B, C, H, W), dtype=jnp.float32)
    # Mirror nn.Parameter(torch.ones(len) * init_val)
    weight = jnp.ones((H,), dtype=jnp.float32) * init_val

    out = scalar_weight(x, weight, force_pallas=True)
    out = jax.block_until_ready(out)
    ref = x * weight[:, None]
    assert out.shape == ref.shape and out.dtype == ref.dtype
    assert jnp.allclose(out, ref, atol=1e-6, rtol=1e-6)

    # Case 2: exercise multi-block tiling (row-partial last block) with small tiles.
    B2, C2, H2, W2 = 2, 5, 16, 24          # R = 10 rows (partial vs tm=8), Lw = 384 lanes
    x2 = jax.random.normal(k2, (B2, C2, H2, W2), dtype=jnp.float32)
    w2 = jnp.linspace(0.1, 1.0, H2, dtype=jnp.float32)
    out2 = jax.block_until_ready(scalar_weight(x2, w2, force_pallas=True, tm=8, tn=128))
    ref2 = x2 * w2[:, None]
    assert jnp.allclose(out2, ref2, atol=1e-6, rtol=1e-6)

    # Case 3: default module config (len == 1) via the small-input fast path.
    w3 = jnp.ones((1,), dtype=jnp.float32) * 2.0
    out3 = jax.block_until_ready(scalar_weight(x, w3))
    assert jnp.allclose(out3, x * w3[:, None], atol=1e-6, rtol=1e-6)

    print("KERNEL_OK")
</pallas_src>

<mosaic_0001>
module attributes {stable_mosaic.version = 11 : i64} {
  func.func @scalar_weight_kernel(%arg0: i32, %arg1: i32, %arg2: memref<8x256xf32, #tpu.memory_space<vmem>>, %arg3: memref<1x256xf32, #tpu.memory_space<vmem>>, %arg4: memref<8x256xf32, #tpu.memory_space<vmem>>) attributes {dimension_semantics = [#tpu.dimension_semantics<parallel>, #tpu.dimension_semantics<parallel>], iteration_bounds = array<i64: 1, 1>, scalar_prefetch = 0 : i64, scratch_operands = 0 : i64, tpu.core_type = #tpu.core_type<tc>, window_params = [{transform_indices = @transform_0, window_bounds = array<i64: 8, 256>}, {transform_indices = @transform_1, window_bounds = array<i64: 1, 256>}, {transform_indices = @transform_2, window_bounds = array<i64: 8, 256>}]} {
    %c0 = arith.constant 0 : index
    %c0_0 = arith.constant 0 : index
    %0 = vector.load %arg2[%c0, %c0_0] : memref<8x256xf32, #tpu.memory_space<vmem>>, vector<8x256xf32>
    %c0_1 = arith.constant 0 : index
    %c0_2 = arith.constant 0 : index
    %1 = vector.load %arg3[%c0_1, %c0_2] : memref<1x256xf32, #tpu.memory_space<vmem>>, vector<1x256xf32>
    %2 = vector.broadcast %1 : vector<1x256xf32> to vector<8x256xf32>
    %3 = arith.mulf %0, %2 : vector<8x256xf32>
    %c0_3 = arith.constant 0 : index
    %c0_4 = arith.constant 0 : index
    %4 = vector.load %arg4[%c0_3, %c0_4] : memref<8x256xf32, #tpu.memory_space<vmem>>, vector<8x256xf32>
    tpu.vector_store %arg4[%c0_3, %c0_4], %3 {strides = array<i32>} : memref<8x256xf32, #tpu.memory_space<vmem>>, vector<8x256xf32>,
    return
  }
  func.func @transform_0(%arg0: i32, %arg1: i32) -> (i32, i32) {
    %c0_i32 = arith.constant 0 : i32
    return %arg0, %arg1 : i32, i32
  }
  func.func @transform_1(%arg0: i32, %arg1: i32) -> (i32, i32) {
    %c0_i32 = arith.constant 0 : i32
    %c0_i32_0 = arith.constant 0 : i32
    return %c0_i32, %arg1 : i32, i32
  }
  func.func @transform_2(%arg0: i32, %arg1: i32) -> (i32, i32) {
    %c0_i32 = arith.constant 0 : i32
    return %arg0, %arg1 : i32, i32
  }
}

</mosaic_0001>

<bundles_post_ra>
// kernel: tpu_custom_call.1
= control target key start
LH: loop header
LB: loop body
LE: loop exit
PB: predicated region body
PF: predicated region fallthrough
CT: control target
= control target key end

     0   :  { %7 = vsyncpa [#allocation3], 0  ;;  %s166_s0 = inlined_call_operand.hbm [shape: f32[8,256], index: 0, kind: input, shape index: {}]   ;;  %s167_s1 = inlined_call_operand.hbm [shape: f32[1,256], index: 1, kind: input, shape index: {}]   ;;  %s168_s2 = inlined_call_operand.hbm [shape: f32[8,256], index: 2, kind: output, shape index: {}]  }
   0x1   :  { %8 = vsyncpa [#allocation6], 0 }
   0x2   :  { %9 = vsyncpa [#allocation4], 0  ;;  %s139_s9 = smov [#allocation2]   ;;  %s140_s11 = smov [#allocation5]  }
   0x3   :  { %s16_s10 = sshll.u32 %s139_s9, 4  ;;  %s26_s12 = sshll.u32 %s140_s11, 4  ;;  %s17_s10 = int_to_ptr.vmem [resolvable:$true] %s16_s10  ;;  %s27_s12 = int_to_ptr.vmem [resolvable:$true] %s26_s12 }
   0x4   :  { %s81_s13 = scalar_lea.vmem %s17_s10, 256  ;;  %p86_p1 = scmp.lt.s32.totalorder %s17_s10, %s17_s10 }
   0x5   :  { %p82_p0 = scmp.ne.s32.totalorder %s17_s10, %s81_s13  ;;  %p87_p2 = scmp.lt.s32.totalorder %s81_s13, %s81_s13 }
   0x7   :  { %p88_p3 = por %p87_p2, %p86_p1 }
   0x9   :  { %p89_p4 = pnand %p88_p3, %p82_p0 }
   0xb   :  { %92 = shalt.err (!%p89_p4)
}
   0xc   :  { %19 = dma.hbm_to_vmem [thread:$0]  %s166_s0, 256, %s17_s10, [#allocation3]  }
   0xd   :  { %s101_s16 = scalar_lea.vmem %s27_s12, 32  ;;  %p106_p6 = scmp.lt.s32.totalorder %s27_s12, %s27_s12 }
   0xe   :  { %p102_p5 = scmp.ne.s32.totalorder %s27_s12, %s101_s16  ;;  %p107_p7 = scmp.lt.s32.totalorder %s101_s16, %s101_s16 }
  0x10   :  { %p108_p8 = por %p107_p7, %p106_p6 }
  0x12   :  { %p109_p9 = pnand %p108_p8, %p102_p5 }
  0x14   :  { %112 = shalt.err (!%p109_p9)
}
  0x15   :  { %29 = dma.hbm_to_vmem [thread:$0]  %s167_s1, 32, %s27_s12, [#allocation6]  }
  0x16   :  { %133 = dma.done.wait [#allocation3], 256  }
  0x17   :  { %134 = vsyncadd [#allocation3], 4294967040 }
  0x18   :  { %135 = dma.done.wait [#allocation6], 32  }
  0x19   :  { %136 = vsyncadd [#allocation6], 4294967264  ;;  %v40_v0 = vlaneseq  ;;  %v36_v4 = vld [vmem:[#allocation2] sm:$0xff]  ;;  %v38_v5 = vld [vmem:[#allocation5] sm:$0x3]  ;;  %s141_s0 = smov [#allocation7]  }
  0x1a   :  { %v37_v6 = vld [vmem:[#allocation2 + $0x8] sm:$0xff]  ;;  %s60_s19 = sshll.u32 %s141_s0, 4  ;;  %s61_s19 = int_to_ptr.vmem [resolvable:$true] %s60_s19 }
  0x1b   :  { %v41_v1 = vshrl.u32 %v40_v0, 7  ;;  %s113_s1 = scalar_lea.vmem %s61_s19, 256  ;;  %p118_p11 = scmp.lt.s32.totalorder %s61_s19, %s61_s19 }
  0x1c   :  { %p114_p10 = scmp.ne.s32.totalorder %s61_s19, %s113_s1  ;;  %p119_p12 = scmp.lt.s32.totalorder %s113_s1, %s113_s1 }
  0x1d   :  { %v42_v2 = vsub.s32 0, %v41_v1  ;;  %v46_v3 = vsub.s32 1, %v41_v1 }
  0x1e   :  { %p120_p13 = por %p119_p12, %p118_p11 }
  0x1f   :  { %v43_v7 = vrot.slane %v38_v5, %v42_v2  ;;  %v47_v8 = vrot.slane %v38_v5, %v46_v3 }
  0x20   :  { %p121_p0 = pnand %p120_p13, %p114_p10 }
  0x21   :  { %v50_v9 = vmul.f32 %v43_v7, %v36_v4  ;;  %v51_v10 = vmul.f32 %v47_v8, %v37_v6 }
  0x23   :  { %52 = vst [vmem:[#allocation7] sm:$0xff] %v50_v9  ;;  %53 = vst [vmem:[#allocation7 + $0x8] sm:$0xff] %v51_v10 }
  0x24   :  { %124 = shalt.err (!%p121_p0)
}
  0x25   :  { %63 = dma.vmem_to_hbm [thread:$0]  %s61_s19, 256, %s168_s2, [#allocation4]  }
  0x26   :  { %137 = dma.done.wait [#allocation4], 256  }
  0x27   :  { %138 = vsyncadd [#allocation4], 4294967040 }
  0x28   :  { %67 = vsyncpa [#allocation3], 1 }
  0x29   :  { %68 = vsyncpa [#allocation6], 1 }
  0x2a   :  { %69 = vsyncpa [#allocation4], 1 }

</bundles_post_ra>
